<compile_context>
chip_gen: v6e
topology: v6e:2x2x1
jax: 0.10.0
libtpu: 0.0.40
codegen_flags: <defaults>
</compile_context>

<pallas_src>
import math

import jax
import jax.numpy as jnp
from jax.experimental import pallas as pl
from jax.experimental.pallas import tpu as pltpu


def _round_up(a: int, b: int) -> int:
    return (a + b - 1) // b * b


def _gelu_erf(x):
    # Exact erf-based GELU (matches the HuggingFace / PyTorch reference).
    return x * 0.5 * (1.0 + jax.lax.erf(x / math.sqrt(2.0)))


def ffn_kernel(x_ref, w1_ref, b1_ref, w2_ref, b2_ref, o_ref):
    # x_ref:  (tm, Hp)   current row tile (storage dtype)
    # w1_ref: (Hp, Fp)   fc1 weight (resident, [in, out])
    # b1_ref: (1,  Fp)   fc1 bias
    # w2_ref: (Fp, Hp)   fc2 weight (resident, [in, out])
    # b2_ref: (1,  Hp)   fc2 bias
    # o_ref:  (tm, Hp)   output row tile
    x = x_ref[...]  # no f32 upcast: bf16-native MXU path when inputs are bf16
    h = jnp.dot(x, w1_ref[...], preferred_element_type=jnp.float32)
    h = h + b1_ref[...].astype(jnp.float32)        # f32 bias add
    h = _gelu_erf(h)                               # f32 GELU
    h = h.astype(w2_ref.dtype)                     # back to MXU-native dtype
    y = jnp.dot(h, w2_ref[...], preferred_element_type=jnp.float32)
    y = y + b2_ref[...].astype(jnp.float32)
    o_ref[...] = y.astype(o_ref.dtype)


def _ffn_pallas_call(xp, w1p, b1p, w2p, b2p, *, tm, single_buffer_weights):
    Mp, Hp = xp.shape
    Fp = w1p.shape[1]
    grid_m = Mp // tm

    def const_spec(shape):
        idx = lambda i: (0, 0)
        if single_buffer_weights:
            # Weights never change across the grid -> drop the second buffer.
            return pl.BlockSpec(shape, idx, pipeline_mode=pl.Buffered(1))
        return pl.BlockSpec(shape, idx)

    itemsize = xp.dtype.itemsize
    n_wbuf = 1 if single_buffer_weights else 2
    vmem_est = (
        n_wbuf * (Hp * Fp + Fp + Fp * Hp + Hp) * itemsize  # resident weights/biases
        + 2 * 2 * tm * Hp * itemsize                       # x/out tiles, double-buffered
        + tm * Fp * 4 + tm * Hp * 4                        # f32 intermediates
    )
    vmem_limit = max(32 << 20, min(int(vmem_est * 1.5) + (2 << 20), 100 << 20))

    cost = pl.CostEstimate(
        flops=4 * Mp * Hp * Fp,                 # two matmuls: 2*M*H*F each
        transcendentals=Mp * Fp,                # one erf per hidden_ff element
        bytes_accessed=int(
            (xp.size + w1p.size + b1p.size + w2p.size + b2p.size + Mp * Hp)
            * itemsize),
    )

    return pl.pallas_call(
        ffn_kernel,
        out_shape=jax.ShapeDtypeStruct((Mp, Hp), xp.dtype),
        grid_spec=pltpu.PrefetchScalarGridSpec(
            num_scalar_prefetch=0,
            grid=(grid_m,),
            in_specs=[
                pl.BlockSpec((tm, Hp), lambda i: (i, 0)),   # x row tiles
                const_spec((Hp, Fp)),                       # w1 (resident)
                const_spec((1, Fp)),                        # b1
                const_spec((Fp, Hp)),                       # w2 (resident)
                const_spec((1, Hp)),                        # b2
            ],
            out_specs=pl.BlockSpec((tm, Hp), lambda i: (i, 0)),
        ),
        compiler_params=pltpu.CompilerParams(
            dimension_semantics=("parallel",),              # megacore-shard rows
            vmem_limit_bytes=vmem_limit,
        ),
        cost_estimate=cost,
    )(xp, w1p, b1p, w2p, b2p)


def position_wise_feed_forward(x, w1, b1, w2, b2, *, tm=256):
    """x: [B, S, H]; w1: [H, F]; b1: [F]; w2: [F, H]; b2: [H] -> [B, S, H].

    Weights are [in, out] (transpose of PyTorch nn.Linear's [out, in]).
    """
    B, S, H = x.shape
    F = w1.shape[1]
    M = B * S

    # Row tile: large enough to fill the MXU for real shapes; shrunk to a
    # sublane-aligned size for tiny inputs. Zero-pad rows instead of asserting.
    tm_eff = min(tm, _round_up(M, 8))
    Mp = _round_up(M, tm_eff)
    # Lane-dense feature dims (multiples of 128) -> unmasked vector stores.
    Hp = _round_up(H, 128)
    Fp = _round_up(F, 128)
    # NOTE: weights are kept fully resident in VMEM. For very large H*F
    # (e.g. H>=2048, F=4H on v7x's 64 MiB VMEM) an extra "arbitrary" grid axis
    # over F with an f32 accumulator would be needed instead.

    xp = jnp.pad(x.reshape(M, H), ((0, Mp - M), (0, Hp - H)))
    w1p = jnp.pad(w1, ((0, Hp - H), (0, Fp - F)))
    b1p = jnp.pad(b1, (0, Fp - F)).reshape(1, Fp)
    w2p = jnp.pad(w2, ((0, Fp - F), (0, Hp - H)))
    b2p = jnp.pad(b2, (0, Hp - H)).reshape(1, Hp)

    try:
        out = _ffn_pallas_call(xp, w1p, b1p, w2p, b2p,
                               tm=tm_eff, single_buffer_weights=True)
    except Exception:
        # Fallback if this jax/Mosaic build rejects Buffered(1) single-buffering.
        out = _ffn_pallas_call(xp, w1p, b1p, w2p, b2p,
                               tm=tm_eff, single_buffer_weights=False)

    return out[:M, :H].reshape(B, S, H)


if __name__ == "__main__":
    # cfg.hidden = 32, cfg.hidden_ff = 64  (small synthetic config)
    B, S, H, FF = 2, 8, 32, 64

    key = jax.random.PRNGKey(0)
    kx, kw1, kb1, kw2, kb2 = jax.random.split(key, 5)

    x = jax.random.normal(kx, (B, S, H), dtype=jnp.float32)

    # PyTorch nn.Linear weights are [out, in]; generate in that layout and
    # transpose to [in, out] for the kernel.
    w1_pt = jax.random.normal(kw1, (FF, H), dtype=jnp.float32) * 0.02
    b1 = jax.random.normal(kb1, (FF,), dtype=jnp.float32) * 0.02
    w2_pt = jax.random.normal(kw2, (H, FF), dtype=jnp.float32) * 0.02
    b2 = jax.random.normal(kb2, (H,), dtype=jnp.float32) * 0.02

    w1 = w1_pt.T  # [H, FF]
    w2 = w2_pt.T  # [FF, H]

    y = position_wise_feed_forward(x, w1, b1, w2, b2)
    y = jax.block_until_ready(y)

    # Pure-JAX reference check.
    def ref(x):
        h = x @ w1 + b1
        h = h * 0.5 * (1.0 + jax.lax.erf(h / math.sqrt(2.0)))
        return h @ w2 + b2

    y_ref = ref(x)
    assert y.shape == (B, S, H)
    assert jnp.allclose(y, y_ref, atol=1e-5, rtol=1e-5)

    print("KERNEL_OK")
</pallas_src>

<mosaic_0001>
module attributes {stable_mosaic.version = 11 : i64} {
  func.func @ffn_kernel(%arg0: i32, %arg1: memref<16x128xf32, #tpu.memory_space<vmem>>, %arg2: memref<128x128xf32, #tpu.memory_space<vmem>>, %arg3: memref<1x128xf32, #tpu.memory_space<vmem>>, %arg4: memref<128x128xf32, #tpu.memory_space<vmem>>, %arg5: memref<1x128xf32, #tpu.memory_space<vmem>>, %arg6: memref<16x128xf32, #tpu.memory_space<vmem>>) attributes {dimension_semantics = [#tpu.dimension_semantics<parallel>], iteration_bounds = array<i64: 1>, scalar_prefetch = 0 : i64, scratch_operands = 0 : i64, tpu.core_type = #tpu.core_type<tc>, window_params = [{transform_indices = @transform_0, window_bounds = array<i64: 16, 128>}, {pipeline_mode = #tpu.pipeline_mode<synchronous>, transform_indices = @transform_1, window_bounds = array<i64: 128, 128>}, {pipeline_mode = #tpu.pipeline_mode<synchronous>, transform_indices = @transform_2, window_bounds = array<i64: 1, 128>}, {pipeline_mode = #tpu.pipeline_mode<synchronous>, transform_indices = @transform_3, window_bounds = array<i64: 128, 128>}, {pipeline_mode = #tpu.pipeline_mode<synchronous>, transform_indices = @transform_4, window_bounds = array<i64: 1, 128>}, {transform_indices = @transform_5, window_bounds = array<i64: 16, 128>}]} {
    %c0 = arith.constant 0 : index
    %c0_0 = arith.constant 0 : index
    %0 = vector.load %arg1[%c0, %c0_0] : memref<16x128xf32, #tpu.memory_space<vmem>>, vector<16x128xf32>
    %c0_1 = arith.constant 0 : index
    %c0_2 = arith.constant 0 : index
    %1 = vector.load %arg2[%c0_1, %c0_2] : memref<128x128xf32, #tpu.memory_space<vmem>>, vector<128x128xf32>
    %cst = arith.constant dense<0.000000e+00> : vector<16x128xf32>
    %2 = tpu.matmul %0, %1, %cst {dimension_numbers = #tpu.dot_dimension_numbers<[1], [0], [0], [1], [0, 0, 1, 1], [], []>} : vector<16x128xf32>, vector<128x128xf32>, vector<16x128xf32> -> vector<16x128xf32>
    %c0_3 = arith.constant 0 : index
    %c0_4 = arith.constant 0 : index
    %3 = vector.load %arg3[%c0_3, %c0_4] : memref<1x128xf32, #tpu.memory_space<vmem>>, vector<1x128xf32>
    %4 = vector.broadcast %3 : vector<1x128xf32> to vector<16x128xf32>
    %5 = arith.addf %2, %4 : vector<16x128xf32>
    %cst_5 = arith.constant 5.000000e-01 : f32
    %6 = vector.broadcast %cst_5 : f32 to vector<16x128xf32>
    %7 = arith.mulf %5, %6 : vector<16x128xf32>
    %cst_6 = arith.constant 1.41421354 : f32
    %8 = vector.broadcast %cst_6 : f32 to vector<16x128xf32>
    %9 = arith.divf %5, %8 : vector<16x128xf32>
    %10 = math.erf %9 : vector<16x128xf32>
    %cst_7 = arith.constant 1.000000e+00 : f32
    %11 = vector.broadcast %cst_7 : f32 to vector<16x128xf32>
    %12 = arith.addf %11, %10 : vector<16x128xf32>
    %13 = arith.mulf %7, %12 : vector<16x128xf32>
    %c0_8 = arith.constant 0 : index
    %c0_9 = arith.constant 0 : index
    %14 = vector.load %arg4[%c0_8, %c0_9] : memref<128x128xf32, #tpu.memory_space<vmem>>, vector<128x128xf32>
    %cst_10 = arith.constant dense<0.000000e+00> : vector<16x128xf32>
    %15 = tpu.matmul %13, %14, %cst_10 {dimension_numbers = #tpu.dot_dimension_numbers<[1], [0], [0], [1], [0, 0, 1, 1], [], []>} : vector<16x128xf32>, vector<128x128xf32>, vector<16x128xf32> -> vector<16x128xf32>
    %c0_11 = arith.constant 0 : index
    %c0_12 = arith.constant 0 : index
    %16 = vector.load %arg5[%c0_11, %c0_12] : memref<1x128xf32, #tpu.memory_space<vmem>>, vector<1x128xf32>
    %17 = vector.broadcast %16 : vector<1x128xf32> to vector<16x128xf32>
    %18 = arith.addf %15, %17 : vector<16x128xf32>
    %c0_13 = arith.constant 0 : index
    %c0_14 = arith.constant 0 : index
    %19 = vector.load %arg6[%c0_13, %c0_14] : memref<16x128xf32, #tpu.memory_space<vmem>>, vector<16x128xf32>
    tpu.vector_store %arg6[%c0_13, %c0_14], %18 {strides = array<i32>} : memref<16x128xf32, #tpu.memory_space<vmem>>, vector<16x128xf32>,
    return
  }
  func.func @transform_0(%arg0: i32) -> (i32, i32) {
    %c0_i32 = arith.constant 0 : i32
    %c0_i32_0 = arith.constant 0 : i32
    return %arg0, %c0_i32 : i32, i32
  }
  func.func @transform_1(%arg0: i32) -> (i32, i32) {
    %c0_i32 = arith.constant 0 : i32
    %c0_i32_0 = arith.constant 0 : i32
    %c0_i32_1 = arith.constant 0 : i32
    return %c0_i32, %c0_i32_0 : i32, i32
  }
  func.func @transform_2(%arg0: i32) -> (i32, i32) {
    %c0_i32 = arith.constant 0 : i32
    %c0_i32_0 = arith.constant 0 : i32
    %c0_i32_1 = arith.constant 0 : i32
    return %c0_i32, %c0_i32_0 : i32, i32
  }
  func.func @transform_3(%arg0: i32) -> (i32, i32) {
    %c0_i32 = arith.constant 0 : i32
    %c0_i32_0 = arith.constant 0 : i32
    %c0_i32_1 = arith.constant 0 : i32
    return %c0_i32, %c0_i32_0 : i32, i32
  }
  func.func @transform_4(%arg0: i32) -> (i32, i32) {
    %c0_i32 = arith.constant 0 : i32
    %c0_i32_0 = arith.constant 0 : i32
    %c0_i32_1 = arith.constant 0 : i32
    return %c0_i32, %c0_i32_0 : i32, i32
  }
  func.func @transform_5(%arg0: i32) -> (i32, i32) {
    %c0_i32 = arith.constant 0 : i32
    %c0_i32_0 = arith.constant 0 : i32
    return %arg0, %c0_i32 : i32, i32
  }
}

module attributes {stable_mosaic.version = 11 : i64} {
  func.func @ffn_kernel(%arg0: i32, %arg1: memref<16x128xf32, #tpu.memory_space<vmem>>, %arg2: memref<128x128xf32, #tpu.memory_space<vmem>>, %arg3: memref<1x128xf32, #tpu.memory_space<vmem>>, %arg4: memref<128x128xf32, #tpu.memory_space<vmem>>, %arg5: memref<1x128xf32, #tpu.memory_space<vmem>>, %arg6: memref<16x128xf32, #tpu.memory_space<vmem>>) attributes {dimension_semantics = [#tpu.dimension_semantics<parallel>], iteration_bounds = array<i64: 1>, scalar_prefetch = 0 : i64, scratch_operands = 0 : i64, tpu.core_type = #tpu.core_type<tc>, window_params = [{transform_indices = @transform_0, window_bounds = array<i64: 16, 128>}, {pipeline_mode = #tpu.pipeline_mode<synchronous>, transform_indices = @transform_1, window_bounds = array<i64: 128, 128>}, {pipeline_mode = #tpu.pipeline_mode<synchronous>, transform_indices = @transform_2, window_bounds = array<i64: 1, 128>}, {pipeline_mode = #tpu.pipeline_mode<synchronous>, transform_indices = @transform_3, window_bounds = array<i64: 128, 128>}, {pipeline_mode = #tpu.pipeline_mode<synchronous>, transform_indices = @transform_4, window_bounds = array<i64: 1, 128>}, {transform_indices = @transform_5, window_bounds = array<i64: 16, 128>}]} {
    %c0 = arith.constant 0 : index
    %c0_0 = arith.constant 0 : index
    %0 = vector.load %arg1[%c0, %c0_0] : memref<16x128xf32, #tpu.memory_space<vmem>>, vector<16x128xf32>
    %c0_1 = arith.constant 0 : index
    %c0_2 = arith.constant 0 : index
    %1 = vector.load %arg2[%c0_1, %c0_2] : memref<128x128xf32, #tpu.memory_space<vmem>>, vector<128x128xf32>
    %cst = arith.constant dense<0.000000e+00> : vector<16x128xf32>
    %2 = tpu.matmul %0, %1, %cst {dimension_numbers = #tpu.dot_dimension_numbers<[1], [0], [0], [1], [0, 0, 1, 1], [], []>} : vector<16x128xf32>, vector<128x128xf32>, vector<16x128xf32> -> vector<16x128xf32>
    %c0_3 = arith.constant 0 : index
    %c0_4 = arith.constant 0 : index
    %3 = vector.load %arg3[%c0_3, %c0_4] : memref<1x128xf32, #tpu.memory_space<vmem>>, vector<1x128xf32>
    %4 = vector.broadcast %3 : vector<1x128xf32> to vector<16x128xf32>
    %5 = arith.addf %2, %4 : vector<16x128xf32>
    %cst_5 = arith.constant 5.000000e-01 : f32
    %6 = vector.broadcast %cst_5 : f32 to vector<16x128xf32>
    %7 = arith.mulf %5, %6 : vector<16x128xf32>
    %cst_6 = arith.constant 1.41421354 : f32
    %8 = vector.broadcast %cst_6 : f32 to vector<16x128xf32>
    %9 = arith.divf %5, %8 : vector<16x128xf32>
    %10 = math.erf %9 : vector<16x128xf32>
    %cst_7 = arith.constant 1.000000e+00 : f32
    %11 = vector.broadcast %cst_7 : f32 to vector<16x128xf32>
    %12 = arith.addf %11, %10 : vector<16x128xf32>
    %13 = arith.mulf %7, %12 : vector<16x128xf32>
    %c0_8 = arith.constant 0 : index
    %c0_9 = arith.constant 0 : index
    %14 = vector.load %arg4[%c0_8, %c0_9] : memref<128x128xf32, #tpu.memory_space<vmem>>, vector<128x128xf32>
    %cst_10 = arith.constant dense<0.000000e+00> : vector<16x128xf32>
    %15 = tpu.matmul %13, %14, %cst_10 {dimension_numbers = #tpu.dot_dimension_numbers<[1], [0], [0], [1], [0, 0, 1, 1], [], []>} : vector<16x128xf32>, vector<128x128xf32>, vector<16x128xf32> -> vector<16x128xf32>
    %c0_11 = arith.constant 0 : index
    %c0_12 = arith.constant 0 : index
    %16 = vector.load %arg5[%c0_11, %c0_12] : memref<1x128xf32, #tpu.memory_space<vmem>>, vector<1x128xf32>
    %17 = vector.broadcast %16 : vector<1x128xf32> to vector<16x128xf32>
    %18 = arith.addf %15, %17 : vector<16x128xf32>
    %c0_13 = arith.constant 0 : index
    %c0_14 = arith.constant 0 : index
    %19 = vector.load %arg6[%c0_13, %c0_14] : memref<16x128xf32, #tpu.memory_space<vmem>>, vector<16x128xf32>
    tpu.vector_store %arg6[%c0_13, %c0_14], %18 {strides = array<i32>} : memref<16x128xf32, #tpu.memory_space<vmem>>, vector<16x128xf32>,
    return
  }
  func.func @transform_0(%arg0: i32) -> (i32, i32) {
    %c0_i32 = arith.constant 0 : i32
    %c0_i32_0 = arith.constant 0 : i32
    return %arg0, %c0_i32 : i32, i32
  }
  func.func @transform_1(%arg0: i32) -> (i32, i32) {
    %c0_i32 = arith.constant 0 : i32
    %c0_i32_0 = arith.constant 0 : i32
    %c0_i32_1 = arith.constant 0 : i32
    return %c0_i32, %c0_i32_0 : i32, i32
  }
  func.func @transform_2(%arg0: i32) -> (i32, i32) {
    %c0_i32 = arith.constant 0 : i32
    %c0_i32_0 = arith.constant 0 : i32
    %c0_i32_1 = arith.constant 0 : i32
    return %c0_i32, %c0_i32_0 : i32, i32
  }
  func.func @transform_3(%arg0: i32) -> (i32, i32) {
    %c0_i32 = arith.constant 0 : i32
    %c0_i32_0 = arith.constant 0 : i32
    %c0_i32_1 = arith.constant 0 : i32
    return %c0_i32, %c0_i32_0 : i32, i32
  }
  func.func @transform_4(%arg0: i32) -> (i32, i32) {
    %c0_i32 = arith.constant 0 : i32
    %c0_i32_0 = arith.constant 0 : i32
    %c0_i32_1 = arith.constant 0 : i32
    return %c0_i32, %c0_i32_0 : i32, i32
  }
  func.func @transform_5(%arg0: i32) -> (i32, i32) {
    %c0_i32 = arith.constant 0 : i32
    %c0_i32_0 = arith.constant 0 : i32
    return %arg0, %c0_i32 : i32, i32
  }
}

</mosaic_0001>

<bundles_post_ra>
// kernel: tpu_custom_call.1
= control target key start
LH: loop header
LB: loop body
LE: loop exit
PB: predicated region body
PF: predicated region fallthrough
CT: control target
= control target key end

     0   :  { %10 = vsyncpa [#allocation3], 0  ;;  %s561_s0 = inlined_call_operand.hbm [shape: f32[16,128], index: 0, kind: input, shape index: {}]   ;;  %s562_s1 = inlined_call_operand.hbm [shape: f32[128,128], index: 1, kind: input, shape index: {}]   ;;  %s563_s2 = inlined_call_operand.vmem [shape: f32[1,128], index: 2, kind: input, shape index: {}]   ;;  %s564_s3 = inlined_call_operand.hbm [shape: f32[128,128], index: 3, kind: input, shape index: {}]   ;;  %s565_s4 = inlined_call_operand.vmem [shape: f32[1,128], index: 4, kind: input, shape index: {}]   ;;  %s566_s5 = inlined_call_operand.hbm [shape: f32[16,128], index: 5, kind: output, shape index: {}]  }
   0x1   :  { %11 = vsyncpa [#allocation6], 0 }
   0x2   :  { %12 = vsyncpa [#allocation4], 0  ;;  %s495_s18 = smov [#allocation5]   ;;  %s496_s20 = smov [#allocation2]  }
   0x3   :  { %s30_s19 = sshll.u32 %s495_s18, 4  ;;  %s18_s21 = sshll.u32 %s496_s20, 4  ;;  %s31_s19 = int_to_ptr.vmem [resolvable:$true] %s30_s19  ;;  %s19_s21 = int_to_ptr.vmem [resolvable:$true] %s18_s21 }
   0x4   :  { %s417_s22 = scalar_lea.vmem %s31_s19, 2048  ;;  %p422_p1 = scmp.lt.s32.totalorder %s31_s19, %s31_s19 }
   0x5   :  { %p418_p0 = scmp.ne.s32.totalorder %s31_s19, %s417_s22  ;;  %p423_p2 = scmp.lt.s32.totalorder %s417_s22, %s417_s22 }
   0x7   :  { %p424_p3 = por %p423_p2, %p422_p1 }
   0x9   :  { %p425_p4 = pnand %p424_p3, %p418_p0 }
   0xb   :  { %428 = shalt.err (!%p425_p4)
}
   0xc   :  { %s497_s23 = smov 128   ;;  %s498_s24 = smov 8  }
   0xd   :  { %36 = dma.hbm_to_vmem [thread:$0]  %s562_s1, 2048, %s31_s19, [#allocation6], %s497_s23, %s497_s23, %s498_s24  }
   0xe   :  { %s437_s27 = scalar_lea.vmem %s19_s21, 256  ;;  %p442_p6 = scmp.lt.s32.totalorder %s19_s21, %s19_s21 }
   0xf   :  { %p438_p5 = scmp.ne.s32.totalorder %s19_s21, %s437_s27  ;;  %p443_p7 = scmp.lt.s32.totalorder %s437_s27, %s437_s27 }
  0x11   :  { %p444_p8 = por %p443_p7, %p442_p6 }
  0x13   :  { %p445_p9 = pnand %p444_p8, %p438_p5 }
  0x15   :  { %448 = shalt.err (!%p445_p9)
}
  0x16   :  { %24 = dma.hbm_to_vmem [thread:$0]  %s561_s0, 256, %s19_s21, [#allocation3], %s497_s23, %s497_s23, %s498_s24  }
  0x17   :  { %s499_s30 = smov [#allocation7]  }
  0x18   :  { %s44_s6 = sshll.u32 %s499_s30, 4  ;;  %s45_s6 = int_to_ptr.vmem [resolvable:$true] %s44_s6 }
  0x19   :  { %s457_s7 = scalar_lea.vmem %s45_s6, 2048  ;;  %p462_p11 = scmp.lt.s32.totalorder %s45_s6, %s45_s6 }
  0x1a   :  { %p458_p10 = scmp.ne.s32.totalorder %s45_s6, %s457_s7  ;;  %p463_p12 = scmp.lt.s32.totalorder %s457_s7, %s457_s7 }
  0x1c   :  { %p464_p13 = por %p463_p12, %p462_p11 }
  0x1e   :  { %p465_p0 = pnand %p464_p13, %p458_p10 }
  0x20   :  { %468 = shalt.err (!%p465_p0)
}
  0x21   :  { %50 = dma.hbm_to_vmem [thread:$0]  %s564_s3, 2048, %s45_s6, [#allocation6], %s497_s23, %s497_s23, %s498_s24  }
  0x22   :  { %489 = dma.done.wait [#allocation3], 256  }
  0x23   :  { %490 = vsyncadd [#allocation3], 4294967040 }
  0x24   :  { %491 = dma.done.wait [#allocation6], 4096  }
  0x25   :  { %492 = vsyncadd [#allocation6], 4294963200  ;;  %v79_v0 = vld [vmem:[#allocation5 + $0x78] sm:$0xff]  ;;  %v78_v1 = vld [vmem:[#allocation5 + $0x70] sm:$0xff]  ;;  %s500_s10 = smov [#allocation8]  }
  0x26   :  { %329 = vmatprep.subr.mxu0 %v79_v0  ;;  %v77_v2 = vld [vmem:[#allocation5 + $0x68] sm:$0xff]  ;;  %v76_v3 = vld [vmem:[#allocation5 + $0x60] sm:$0xff]  ;;  %v62_v4 = vld [vmem:[#allocation2] sm:$0xff]  ;;  %s278_s11 = sshll.u32 %s500_s10, 4  ;;  %s279_s11 = int_to_ptr.vmem [resolvable:$true] %s278_s11 }
  0x27   :  { %330 = vmatpush3.msra.mxu0 %v79_v0  ;;  %v75_v5 = vld [vmem:[#allocation5 + $0x58] sm:$0xff]  ;;  %361 = vmatprep.mubr.f32.mxu0 %v62_v4  ;;  %v187_v7 = vld [vmem:[#allocation7 + $0x70] sm:$0xff]  ;;  %v186_v9 = vld [vmem:[#allocation7 + $0x68] sm:$0xff]  ;;  %s469_s12 = scalar_lea.vmem %s279_s11, 256  ;;  %p474_p2 = scmp.lt.s32.totalorder %s279_s11, %s279_s11 }
  0x28   :  { %331 = vmatprep.subr.mxu0 %v78_v1  ;;  %v188_v6 = vld [vmem:[#allocation7 + $0x78] sm:$0xff]  ;;  %v74_v8 = vld [vmem:[#allocation5 + $0x50] sm:$0xff]  ;;  %v73_v10 = vld [vmem:[#allocation5 + $0x48] sm:$0xff]  ;;  %p470_p1 = scmp.ne.s32.totalorder %s279_s11, %s469_s12  ;;  %p475_p3 = scmp.lt.s32.totalorder %s469_s12, %s469_s12 }
  0x29   :  { %332 = vmatpush3.msra.mxu0 %v78_v1  ;;  %364 = vmatprep.subr.mxu1 %v188_v6  ;;  %v72_v11 = vld [vmem:[#allocation5 + $0x40] sm:$0xff]  ;;  %v71_v12 = vld [vmem:[#allocation5 + $0x38] sm:$0xff]  ;;  %v70_v13 = vld [vmem:[#allocation5 + $0x30] sm:$0xff] }
  0x2a   :  { %333 = vmatprep.subr.mxu0 %v77_v2  ;;  %365 = vmatpush3.msra.mxu1 %v188_v6  ;;  %v69_v14 = vld [vmem:[#allocation5 + $0x28] sm:$0xff]  ;;  %v68_v15 = vld [vmem:[#allocation5 + $0x20] sm:$0xff]  ;;  %v67_v16 = vld [vmem:[#allocation5 + $0x18] sm:$0xff]  ;;  %p476_p4 = por %p475_p3, %p474_p2 }
  0x2b   :  { %334 = vmatpush3.msra.mxu0 %v77_v2  ;;  %366 = vmatprep.subr.mxu1 %v187_v7  ;;  %v66_v17 = vld [vmem:[#allocation5 + $0x10] sm:$0xff]  ;;  %v65_v18 = vld [vmem:[#allocation5 + $0x8] sm:$0xff]  ;;  %v64_v19 = vld [vmem:[#allocation5] sm:$0xff] }
  0x2c   :  { %335 = vmatprep.subr.mxu0 %v76_v3  ;;  %367 = vmatpush3.msra.mxu1 %v187_v7  ;;  %v63_v20 = vld [vmem:[#allocation2 + $0x8] sm:$0xff]  ;;  %v185_v21 = vld [vmem:[#allocation7 + $0x60] sm:$0xff]  ;;  %v183_v23 = vld [vmem:[#allocation7 + $0x50] sm:$0xff]  ;;  %p477_p5 = pnand %p476_p4, %p470_p1 }
  0x2d   :  { %336 = vmatpush3.msra.mxu0 %v76_v3  ;;  %368 = vmatprep.subr.mxu1 %v186_v9  ;;  %v184_v22 = vld [vmem:[#allocation7 + $0x58] sm:$0xff]  ;;  %v182_v24 = vld [vmem:[#allocation7 + $0x48] sm:$0xff]  ;;  %v181_v25 = vld [vmem:[#allocation7 + $0x40] sm:$0xff] }
  0x2e   :  { %337 = vmatprep.subr.mxu0 %v75_v5  ;;  %369 = vmatpush3.msra.mxu1 %v186_v9  ;;  %v180_v26 = vld [vmem:[#allocation7 + $0x38] sm:$0xff]  ;;  %v179_v27 = vld [vmem:[#allocation7 + $0x30] sm:$0xff]  ;;  %v178_v28 = vld [vmem:[#allocation7 + $0x28] sm:$0xff] }
  0x2f   :  { %338 = vmatpush3.msra.mxu0 %v75_v5  ;;  %370 = vmatprep.subr.mxu1 %v185_v21  ;;  %v177_v29 = vld [vmem:[#allocation7 + $0x20] sm:$0xff]  ;;  %v176_v30 = vld [vmem:[#allocation7 + $0x18] sm:$0xff]  ;;  %v175_v31 = vld [vmem:[#allocation7 + $0x10] sm:$0xff] }
  0x30   :  { %339 = vmatprep.subr.mxu0 %v74_v8  ;;  %371 = vmatpush3.msra.mxu1 %v185_v21  ;;  %v174_v32 = vld [vmem:[#allocation7 + $0x8] sm:$0xff]  ;;  %v173_v33 = vld [vmem:[#allocation7] sm:$0xff]  ;;  %v291_v34 = vld [vmem:[%s563_s2] ss:$0 sm:$0xff] }
  0x31   :  { %340 = vmatpush3.msra.mxu0 %v74_v8  ;;  %372 = vmatprep.subr.mxu1 %v184_v22  ;;  %v292_v49 = vld [vmem:[%s565_s4] ss:$0 sm:$0xff] }
  0x32   :  { %341 = vmatprep.subr.mxu0 %v73_v10  ;;  %373 = vmatpush3.msra.mxu1 %v184_v22 }
  0x33   :  { %342 = vmatpush3.msra.mxu0 %v73_v10  ;;  %374 = vmatprep.subr.mxu1 %v183_v23 }
  0x34   :  { %343 = vmatprep.subr.mxu0 %v72_v11  ;;  %375 = vmatpush3.msra.mxu1 %v183_v23 }
  0x35   :  { %344 = vmatpush3.msra.mxu0 %v72_v11  ;;  %376 = vmatprep.subr.mxu1 %v182_v24 }
  0x36   :  { %345 = vmatprep.subr.mxu0 %v71_v12  ;;  %377 = vmatpush3.msra.mxu1 %v182_v24 }
  0x37   :  { %346 = vmatpush3.msra.mxu0 %v71_v12  ;;  %378 = vmatprep.subr.mxu1 %v181_v25 }
  0x38   :  { %347 = vmatprep.subr.mxu0 %v70_v13  ;;  %379 = vmatpush3.msra.mxu1 %v181_v25 }
  0x39   :  { %348 = vmatpush3.msra.mxu0 %v70_v13  ;;  %380 = vmatprep.subr.mxu1 %v180_v26 }
  0x3a   :  { %349 = vmatprep.subr.mxu0 %v69_v14  ;;  %381 = vmatpush3.msra.mxu1 %v180_v26 }
  0x3b   :  { %350 = vmatpush3.msra.mxu0 %v69_v14  ;;  %382 = vmatprep.subr.mxu1 %v179_v27 }
  0x3c   :  { %351 = vmatprep.subr.mxu0 %v68_v15  ;;  %383 = vmatpush3.msra.mxu1 %v179_v27 }
  0x3d   :  { %352 = vmatpush3.msra.mxu0 %v68_v15  ;;  %384 = vmatprep.subr.mxu1 %v178_v28 }
  0x3e   :  { %353 = vmatprep.subr.mxu0 %v67_v16  ;;  %385 = vmatpush3.msra.mxu1 %v178_v28 }
  0x3f   :  { %354 = vmatpush3.msra.mxu0 %v67_v16  ;;  %386 = vmatprep.subr.mxu1 %v177_v29 }
  0x40   :  { %355 = vmatprep.subr.mxu0 %v66_v17  ;;  %387 = vmatpush3.msra.mxu1 %v177_v29 }
  0x41   :  { %356 = vmatpush3.msra.mxu0 %v66_v17  ;;  %388 = vmatprep.subr.mxu1 %v176_v30 }
  0x42   :  { %357 = vmatprep.subr.mxu0 %v65_v18  ;;  %389 = vmatpush3.msra.mxu1 %v176_v30 }
  0x43   :  { %358 = vmatpush3.msra.mxu0 %v65_v18  ;;  %390 = vmatprep.subr.mxu1 %v175_v31 }
  0x44   :  { %359 = vmatprep.subr.mxu0 %v64_v19  ;;  %391 = vmatpush3.msra.mxu1 %v175_v31 }
  0x45   :  { %360 = vmatpush3.msra.mxu0 %v64_v19  ;;  %392 = vmatprep.subr.mxu1 %v174_v32 }
  0x46   :  { %362 = vmatmul.mubr.f32.vlgmr.msra.gmra.mxu0 %v63_v20  ;;  %393 = vmatpush3.msra.mxu1 %v174_v32 }
  0x47   :  { %394 = vmatprep.subr.mxu1 %v173_v33 }
  0x48   :  { %395 = vmatpush3.msra.mxu1 %v173_v33 }
 0x106   :  { %v363_v35 = vpop.f32.mrf.mxu0 }
 0x107   :  { %v159_v36 = vadd.f32 %v363_v35, %v291_v34 }
 0x108   :  { %v153_v37 = vpop.f32.mrf.mxu0 }
 0x109   :  { %v166_v38 = vmul.f32 0.70710677, %v159_v36  ;;  %v154_v39 = vadd.f32 %v291_v34, %v153_v37  ;;  %v163_v46 = vmul.f32 0.5, %v159_v36 }
 0x10b   :  { %405 = verf.f32 %v166_v38  ;;  %v165_v40 = vmul.f32 0.70710677, %v154_v39  ;;  %v162_v44 = vmul.f32 0.5, %v154_v39 }
 0x10d   :  { %407 = verf.f32 %v165_v40 }
 0x118   :  { %v406_v41 = vpop.eup %405 }
 0x119   :  { %v170_v43 = vadd.f32 1.0, %v406_v41 }
 0x11a   :  { %v408_v42 = vpop.eup %407 }
 0x11b   :  { %v169_v45 = vadd.f32 1.0, %v408_v42  ;;  %v172_v48 = vmul.f32 %v170_v43, %v163_v46 }
 0x11d   :  { %v171_v47 = vmul.f32 %v169_v45, %v162_v44 }
 0x11f   :  { %396 = vmatprep.mubr.f32.mxu1 %v171_v47 }
 0x120   :  { %397 = vmatmul.mubr.f32.vlgmr.msra.gmra.mxu1 %v172_v48 }
 0x1e0   :  { %v398_v50 = vpop.f32.mrf.mxu1 }
 0x1e1   :  { %v268_v51 = vadd.f32 %v398_v50, %v292_v49 }
 0x1e2   :  { %v262_v52 = vpop.f32.mrf.mxu1 }
 0x1e3   :  { %272 = vst [vmem:[#allocation8 + $0x8] sm:$0xff] %v268_v51  ;;  %v263_v53 = vadd.f32 %v292_v49, %v262_v52 }
 0x1e5   :  { %271 = vst [vmem:[#allocation8] sm:$0xff] %v263_v53 }
 0x1e6   :  { %480 = shalt.err (!%p477_p5)
}
 0x1e7   :  { %284 = dma.vmem_to_hbm [thread:$0]  %s279_s11, 256, %s566_s5, [#allocation4], %s497_s23, %s497_s23, %s498_s24  }
 0x1e8   :  { %493 = dma.done.wait [#allocation4], 256  }
 0x1e9   :  { %494 = vsyncadd [#allocation4], 4294967040 }
 0x1ea   :  { %288 = vsyncpa [#allocation3], 1 }
 0x1eb   :  { %289 = vsyncpa [#allocation6], 1 }
 0x1ec   :  { %290 = vsyncpa [#allocation4], 1 }

// kernel: tpu_custom_call.1
= control target key start
LH: loop header
LB: loop body
LE: loop exit
PB: predicated region body
PF: predicated region fallthrough
CT: control target
= control target key end

     0   :  { %10 = vsyncpa [#allocation3], 0  ;;  %s561_s0 = inlined_call_operand.hbm [shape: f32[16,128], index: 0, kind: input, shape index: {}]   ;;  %s562_s1 = inlined_call_operand.hbm [shape: f32[128,128], index: 1, kind: input, shape index: {}]   ;;  %s563_s2 = inlined_call_operand.vmem [shape: f32[1,128], index: 2, kind: input, shape index: {}]   ;;  %s564_s3 = inlined_call_operand.hbm [shape: f32[128,128], index: 3, kind: input, shape index: {}]   ;;  %s565_s4 = inlined_call_operand.vmem [shape: f32[1,128], index: 4, kind: input, shape index: {}]   ;;  %s566_s5 = inlined_call_operand.hbm [shape: f32[16,128], index: 5, kind: output, shape index: {}]  }
   0x1   :  { %11 = vsyncpa [#allocation6], 0 }
   0x2   :  { %12 = vsyncpa [#allocation4], 0  ;;  %s495_s18 = smov [#allocation5]   ;;  %s496_s20 = smov [#allocation2]  }
   0x3   :  { %s30_s19 = sshll.u32 %s495_s18, 4  ;;  %s18_s21 = sshll.u32 %s496_s20, 4  ;;  %s31_s19 = int_to_ptr.vmem [resolvable:$true] %s30_s19  ;;  %s19_s21 = int_to_ptr.vmem [resolvable:$true] %s18_s21 }
   0x4   :  { %s417_s22 = scalar_lea.vmem %s31_s19, 2048  ;;  %p422_p1 = scmp.lt.s32.totalorder %s31_s19, %s31_s19 }
   0x5   :  { %p418_p0 = scmp.ne.s32.totalorder %s31_s19, %s417_s22  ;;  %p423_p2 = scmp.lt.s32.totalorder %s417_s22, %s417_s22 }
   0x7   :  { %p424_p3 = por %p423_p2, %p422_p1 }
   0x9   :  { %p425_p4 = pnand %p424_p3, %p418_p0 }
   0xb   :  { %428 = shalt.err (!%p425_p4)
}
   0xc   :  { %s497_s23 = smov 128   ;;  %s498_s24 = smov 8  }
   0xd   :  { %36 = dma.hbm_to_vmem [thread:$0]  %s562_s1, 2048, %s31_s19, [#allocation6], %s497_s23, %s497_s23, %s498_s24  }
   0xe   :  { %s437_s27 = scalar_lea.vmem %s19_s21, 256  ;;  %p442_p6 = scmp.lt.s32.totalorder %s19_s21, %s19_s21 }
   0xf   :  { %p438_p5 = scmp.ne.s32.totalorder %s19_s21, %s437_s27  ;;  %p443_p7 = scmp.lt.s32.totalorder %s437_s27, %s437_s27 }
  0x11   :  { %p444_p8 = por %p443_p7, %p442_p6 }
  0x13   :  { %p445_p9 = pnand %p444_p8, %p438_p5 }
  0x15   :  { %448 = shalt.err (!%p445_p9)
}
  0x16   :  { %24 = dma.hbm_to_vmem [thread:$0]  %s561_s0, 256, %s19_s21, [#allocation3], %s497_s23, %s497_s23, %s498_s24  }
  0x17   :  { %s499_s30 = smov [#allocation7]  }
  0x18   :  { %s44_s6 = sshll.u32 %s499_s30, 4  ;;  %s45_s6 = int_to_ptr.vmem [resolvable:$true] %s44_s6 }
  0x19   :  { %s457_s7 = scalar_lea.vmem %s45_s6, 2048  ;;  %p462_p11 = scmp.lt.s32.totalorder %s45_s6, %s45_s6 }
  0x1a   :  { %p458_p10 = scmp.ne.s32.totalorder %s45_s6, %s457_s7  ;;  %p463_p12 = scmp.lt.s32.totalorder %s457_s7, %s457_s7 }
  0x1c   :  { %p464_p13 = por %p463_p12, %p462_p11 }
  0x1e   :  { %p465_p0 = pnand %p464_p13, %p458_p10 }
  0x20   :  { %468 = shalt.err (!%p465_p0)
}
  0x21   :  { %50 = dma.hbm_to_vmem [thread:$0]  %s564_s3, 2048, %s45_s6, [#allocation6], %s497_s23, %s497_s23, %s498_s24  }
  0x22   :  { %489 = dma.done.wait [#allocation3], 256  }
  0x23   :  { %490 = vsyncadd [#allocation3], 4294967040 }
  0x24   :  { %491 = dma.done.wait [#allocation6], 4096  }
  0x25   :  { %492 = vsyncadd [#allocation6], 4294963200  ;;  %v79_v0 = vld [vmem:[#allocation5 + $0x78] sm:$0xff]  ;;  %v78_v1 = vld [vmem:[#allocation5 + $0x70] sm:$0xff]  ;;  %s500_s10 = smov [#allocation8]  }
  0x26   :  { %329 = vmatprep.subr.mxu0 %v79_v0  ;;  %v77_v2 = vld [vmem:[#allocation5 + $0x68] sm:$0xff]  ;;  %v76_v3 = vld [vmem:[#allocation5 + $0x60] sm:$0xff]  ;;  %v62_v4 = vld [vmem:[#allocation2] sm:$0xff]  ;;  %s278_s11 = sshll.u32 %s500_s10, 4  ;;  %s279_s11 = int_to_ptr.vmem [resolvable:$true] %s278_s11 }
  0x27   :  { %330 = vmatpush3.msra.mxu0 %v79_v0  ;;  %v75_v5 = vld [vmem:[#allocation5 + $0x58] sm:$0xff]  ;;  %361 = vmatprep.mubr.f32.mxu0 %v62_v4  ;;  %v187_v7 = vld [vmem:[#allocation7 + $0x70] sm:$0xff]  ;;  %v186_v9 = vld [vmem:[#allocation7 + $0x68] sm:$0xff]  ;;  %s469_s12 = scalar_lea.vmem %s279_s11, 256  ;;  %p474_p2 = scmp.lt.s32.totalorder %s279_s11, %s279_s11 }
  0x28   :  { %331 = vmatprep.subr.mxu0 %v78_v1  ;;  %v188_v6 = vld [vmem:[#allocation7 + $0x78] sm:$0xff]  ;;  %v74_v8 = vld [vmem:[#allocation5 + $0x50] sm:$0xff]  ;;  %v73_v10 = vld [vmem:[#allocation5 + $0x48] sm:$0xff]  ;;  %p470_p1 = scmp.ne.s32.totalorder %s279_s11, %s469_s12  ;;  %p475_p3 = scmp.lt.s32.totalorder %s469_s12, %s469_s12 }
  0x29   :  { %332 = vmatpush3.msra.mxu0 %v78_v1  ;;  %364 = vmatprep.subr.mxu1 %v188_v6  ;;  %v72_v11 = vld [vmem:[#allocation5 + $0x40] sm:$0xff]  ;;  %v71_v12 = vld [vmem:[#allocation5 + $0x38] sm:$0xff]  ;;  %v70_v13 = vld [vmem:[#allocation5 + $0x30] sm:$0xff] }
  0x2a   :  { %333 = vmatprep.subr.mxu0 %v77_v2  ;;  %365 = vmatpush3.msra.mxu1 %v188_v6  ;;  %v69_v14 = vld [vmem:[#allocation5 + $0x28] sm:$0xff]  ;;  %v68_v15 = vld [vmem:[#allocation5 + $0x20] sm:$0xff]  ;;  %v67_v16 = vld [vmem:[#allocation5 + $0x18] sm:$0xff]  ;;  %p476_p4 = por %p475_p3, %p474_p2 }
  0x2b   :  { %334 = vmatpush3.msra.mxu0 %v77_v2  ;;  %366 = vmatprep.subr.mxu1 %v187_v7  ;;  %v66_v17 = vld [vmem:[#allocation5 + $0x10] sm:$0xff]  ;;  %v65_v18 = vld [vmem:[#allocation5 + $0x8] sm:$0xff]  ;;  %v64_v19 = vld [vmem:[#allocation5] sm:$0xff] }
  0x2c   :  { %335 = vmatprep.subr.mxu0 %v76_v3  ;;  %367 = vmatpush3.msra.mxu1 %v187_v7  ;;  %v63_v20 = vld [vmem:[#allocation2 + $0x8] sm:$0xff]  ;;  %v185_v21 = vld [vmem:[#allocation7 + $0x60] sm:$0xff]  ;;  %v183_v23 = vld [vmem:[#allocation7 + $0x50] sm:$0xff]  ;;  %p477_p5 = pnand %p476_p4, %p470_p1 }
  0x2d   :  { %336 = vmatpush3.msra.mxu0 %v76_v3  ;;  %368 = vmatprep.subr.mxu1 %v186_v9  ;;  %v184_v22 = vld [vmem:[#allocation7 + $0x58] sm:$0xff]  ;;  %v182_v24 = vld [vmem:[#allocation7 + $0x48] sm:$0xff]  ;;  %v181_v25 = vld [vmem:[#allocation7 + $0x40] sm:$0xff] }
  0x2e   :  { %337 = vmatprep.subr.mxu0 %v75_v5  ;;  %369 = vmatpush3.msra.mxu1 %v186_v9  ;;  %v180_v26 = vld [vmem:[#allocation7 + $0x38] sm:$0xff]  ;;  %v179_v27 = vld [vmem:[#allocation7 + $0x30] sm:$0xff]  ;;  %v178_v28 = vld [vmem:[#allocation7 + $0x28] sm:$0xff] }
  0x2f   :  { %338 = vmatpush3.msra.mxu0 %v75_v5  ;;  %370 = vmatprep.subr.mxu1 %v185_v21  ;;  %v177_v29 = vld [vmem:[#allocation7 + $0x20] sm:$0xff]  ;;  %v176_v30 = vld [vmem:[#allocation7 + $0x18] sm:$0xff]  ;;  %v175_v31 = vld [vmem:[#allocation7 + $0x10] sm:$0xff] }
  0x30   :  { %339 = vmatprep.subr.mxu0 %v74_v8  ;;  %371 = vmatpush3.msra.mxu1 %v185_v21  ;;  %v174_v32 = vld [vmem:[#allocation7 + $0x8] sm:$0xff]  ;;  %v173_v33 = vld [vmem:[#allocation7] sm:$0xff]  ;;  %v291_v34 = vld [vmem:[%s563_s2] ss:$0 sm:$0xff] }
  0x31   :  { %340 = vmatpush3.msra.mxu0 %v74_v8  ;;  %372 = vmatprep.subr.mxu1 %v184_v22  ;;  %v292_v49 = vld [vmem:[%s565_s4] ss:$0 sm:$0xff] }
  0x32   :  { %341 = vmatprep.subr.mxu0 %v73_v10  ;;  %373 = vmatpush3.msra.mxu1 %v184_v22 }
  0x33   :  { %342 = vmatpush3.msra.mxu0 %v73_v10  ;;  %374 = vmatprep.subr.mxu1 %v183_v23 }
  0x34   :  { %343 = vmatprep.subr.mxu0 %v72_v11  ;;  %375 = vmatpush3.msra.mxu1 %v183_v23 }
  0x35   :  { %344 = vmatpush3.msra.mxu0 %v72_v11  ;;  %376 = vmatprep.subr.mxu1 %v182_v24 }
  0x36   :  { %345 = vmatprep.subr.mxu0 %v71_v12  ;;  %377 = vmatpush3.msra.mxu1 %v182_v24 }
  0x37   :  { %346 = vmatpush3.msra.mxu0 %v71_v12  ;;  %378 = vmatprep.subr.mxu1 %v181_v25 }
  0x38   :  { %347 = vmatprep.subr.mxu0 %v70_v13  ;;  %379 = vmatpush3.msra.mxu1 %v181_v25 }
  0x39   :  { %348 = vmatpush3.msra.mxu0 %v70_v13  ;;  %380 = vmatprep.subr.mxu1 %v180_v26 }
  0x3a   :  { %349 = vmatprep.subr.mxu0 %v69_v14  ;;  %381 = vmatpush3.msra.mxu1 %v180_v26 }
  0x3b   :  { %350 = vmatpush3.msra.mxu0 %v69_v14  ;;  %382 = vmatprep.subr.mxu1 %v179_v27 }
  0x3c   :  { %351 = vmatprep.subr.mxu0 %v68_v15  ;;  %383 = vmatpush3.msra.mxu1 %v179_v27 }
  0x3d   :  { %352 = vmatpush3.msra.mxu0 %v68_v15  ;;  %384 = vmatprep.subr.mxu1 %v178_v28 }
  0x3e   :  { %353 = vmatprep.subr.mxu0 %v67_v16  ;;  %385 = vmatpush3.msra.mxu1 %v178_v28 }
  0x3f   :  { %354 = vmatpush3.msra.mxu0 %v67_v16  ;;  %386 = vmatprep.subr.mxu1 %v177_v29 }
  0x40   :  { %355 = vmatprep.subr.mxu0 %v66_v17  ;;  %387 = vmatpush3.msra.mxu1 %v177_v29 }
  0x41   :  { %356 = vmatpush3.msra.mxu0 %v66_v17  ;;  %388 = vmatprep.subr.mxu1 %v176_v30 }
  0x42   :  { %357 = vmatprep.subr.mxu0 %v65_v18  ;;  %389 = vmatpush3.msra.mxu1 %v176_v30 }
  0x43   :  { %358 = vmatpush3.msra.mxu0 %v65_v18  ;;  %390 = vmatprep.subr.mxu1 %v175_v31 }
  0x44   :  { %359 = vmatprep.subr.mxu0 %v64_v19  ;;  %391 = vmatpush3.msra.mxu1 %v175_v31 }
  0x45   :  { %360 = vmatpush3.msra.mxu0 %v64_v19  ;;  %392 = vmatprep.subr.mxu1 %v174_v32 }
  0x46   :  { %362 = vmatmul.mubr.f32.vlgmr.msra.gmra.mxu0 %v63_v20  ;;  %393 = vmatpush3.msra.mxu1 %v174_v32 }
  0x47   :  { %394 = vmatprep.subr.mxu1 %v173_v33 }
  0x48   :  { %395 = vmatpush3.msra.mxu1 %v173_v33 }
 0x106   :  { %v363_v35 = vpop.f32.mrf.mxu0 }
 0x107   :  { %v159_v36 = vadd.f32 %v363_v35, %v291_v34 }
 0x108   :  { %v153_v37 = vpop.f32.mrf.mxu0 }
 0x109   :  { %v166_v38 = vmul.f32 0.70710677, %v159_v36  ;;  %v154_v39 = vadd.f32 %v291_v34, %v153_v37  ;;  %v163_v46 = vmul.f32 0.5, %v159_v36 }
 0x10b   :  { %405 = verf.f32 %v166_v38  ;;  %v165_v40 = vmul.f32 0.70710677, %v154_v39  ;;  %v162_v44 = vmul.f32 0.5, %v154_v39 }
 0x10d   :  { %407 = verf.f32 %v165_v40 }
 0x118   :  { %v406_v41 = vpop.eup %405 }
 0x119   :  { %v170_v43 = vadd.f32 1.0, %v406_v41 }
 0x11a   :  { %v408_v42 = vpop.eup %407 }
 0x11b   :  { %v169_v45 = vadd.f32 1.0, %v408_v42  ;;  %v172_v48 = vmul.f32 %v170_v43, %v163_v46 }
 0x11d   :  { %v171_v47 = vmul.f32 %v169_v45, %v162_v44 }
 0x11f   :  { %396 = vmatprep.mubr.f32.mxu1 %v171_v47 }
 0x120   :  { %397 = vmatmul.mubr.f32.vlgmr.msra.gmra.mxu1 %v172_v48 }
 0x1e0   :  { %v398_v50 = vpop.f32.mrf.mxu1 }
 0x1e1   :  { %v268_v51 = vadd.f32 %v398_v50, %v292_v49 }
 0x1e2   :  { %v262_v52 = vpop.f32.mrf.mxu1 }
 0x1e3   :  { %272 = vst [vmem:[#allocation8 + $0x8] sm:$0xff] %v268_v51  ;;  %v263_v53 = vadd.f32 %v292_v49, %v262_v52 }
 0x1e5   :  { %271 = vst [vmem:[#allocation8] sm:$0xff] %v263_v53 }
 0x1e6   :  { %480 = shalt.err (!%p477_p5)
}
 0x1e7   :  { %284 = dma.vmem_to_hbm [thread:$0]  %s279_s11, 256, %s566_s5, [#allocation4], %s497_s23, %s497_s23, %s498_s24  }
 0x1e8   :  { %493 = dma.done.wait [#allocation4], 256  }
 0x1e9   :  { %494 = vsyncadd [#allocation4], 4294967040 }
 0x1ea   :  { %288 = vsyncpa [#allocation3], 1 }
 0x1eb   :  { %289 = vsyncpa [#allocation6], 1 }
 0x1ec   :  { %290 = vsyncpa [#allocation4], 1 }

</bundles_post_ra>
